<compile_context>
chip_gen: v5e
topology: v5e:2x2
jax: 0.10.0
libtpu: 0.0.40
codegen_flags: <defaults>
</compile_context>

<pallas_src>
import functools

import numpy as np
import jax
import jax.numpy as jnp
from jax import lax
from jax.experimental import pallas as pl
from jax.experimental.pallas import tpu as pltpu


# ----------------------------------------------------------------------------
# Shared body: 1x1 conv (bf16 MXU, f32 acc) + GroupNorm + ReLU.
# Returns the (Cout, HW) f32 activation, still resident in VMEM/vregs.
# ----------------------------------------------------------------------------
def _conv_gn_relu(x_ref, w_ref, b_ref, gamma_ref, beta_ref, *, num_groups, eps,
                  inv_n):
    x = x_ref[0]                                    # (Cin, HW)   bf16
    w = w_ref[...]                                  # (Cout, Cin) bf16
    # 1x1 conv == one full-Cout MXU matmul in the channels-first layout.
    y = jnp.dot(w, x, preferred_element_type=jnp.float32)          # (Cout, HW) f32
    cout, hw = y.shape
    g = cout // num_groups

    # Group view (G, g, HW); g == 8 sublanes so the split is tile-aligned.
    y3 = y.reshape(num_groups, g, hw) + b_ref[...]                 # bias (G, g, 1)

    # GroupNorm statistics on the f32 accumulator (lane reduce, then sublane).
    gsum = jnp.sum(jnp.sum(y3, axis=2, keepdims=True), axis=1, keepdims=True)
    mean = gsum * inv_n                                            # (G, 1, 1)
    yc = y3 - mean
    gsq = jnp.sum(jnp.sum(yc * yc, axis=2, keepdims=True), axis=1, keepdims=True)
    inv_std = lax.rsqrt(gsq * inv_n + eps)                         # EUP rsqrt

    out3 = jnp.maximum(yc * (inv_std * gamma_ref[...]) + beta_ref[...], 0.0)
    return out3.reshape(cout, hw)                                  # (Cout, HW) f32


# ----------------------------------------------------------------------------
# Kernel A: conv + GN + ReLU only (skip is None).
# ----------------------------------------------------------------------------
def _fpn_kernel(x_ref, w_ref, b_ref, gamma_ref, beta_ref, out_ref, *,
                num_groups, eps, inv_n):
    a = _conv_gn_relu(x_ref, w_ref, b_ref, gamma_ref, beta_ref,
                      num_groups=num_groups, eps=eps, inv_n=inv_n)
    out_ref[0] = a.astype(out_ref.dtype)


# ----------------------------------------------------------------------------
# Kernel B: conv + GN + ReLU + fused bilinear upsample + skip add.
# The resize is one lane-dense matmul: (Cout, HW) @ kron(A_h, A_w)^T.
# ----------------------------------------------------------------------------
def _fpn_skip_kernel(x_ref, w_ref, b_ref, gamma_ref, beta_ref, k_ref, skip_ref,
                     out_ref, *, num_groups, eps, inv_n):
    a = _conv_gn_relu(x_ref, w_ref, b_ref, gamma_ref, beta_ref,
                      num_groups=num_groups, eps=eps, inv_n=inv_n)
    z = jnp.dot(a.astype(k_ref.dtype), k_ref[...],
                preferred_element_type=jnp.float32)                # (Cout, HWout)
    out_ref[0] = (z + skip_ref[0]).astype(out_ref.dtype)


# ----------------------------------------------------------------------------
# Host-side helpers: PyTorch-exact bilinear interpolation matrices
# (F.interpolate(mode='bilinear', align_corners=False)).
# ----------------------------------------------------------------------------
def _bilinear_matrix(out_size, in_size):
    scale = in_size / out_size
    dst = np.arange(out_size, dtype=np.float64)
    src = np.maximum((dst + 0.5) * scale - 0.5, 0.0)    # PyTorch clamps negatives
    i0 = np.minimum(np.floor(src).astype(np.int64), in_size - 1)
    i1 = np.minimum(i0 + 1, in_size - 1)
    w1 = (src - i0).astype(np.float32)
    A = np.zeros((out_size, in_size), dtype=np.float32)
    rows = dst.astype(np.int64)
    np.add.at(A, (rows, i0), 1.0 - w1)
    np.add.at(A, (rows, i1), w1)
    return A


def _resize_kron(hout, wout, hin, win):
    """(Hin*Win, Hout*Wout) matrix s.t. flat_out = flat_in @ K is the bilinear resize."""
    return np.kron(_bilinear_matrix(hout, hin), _bilinear_matrix(wout, win)).T


# ----------------------------------------------------------------------------
# Wrapper: FPNBlock forward.
#   x: [B, Cin, H, W] (NCHW)   w: [Cout, Cin]   b/gamma/beta: [Cout]
#   skip: optional [B, Cout, Hs, Ws]
# ----------------------------------------------------------------------------
def fpn_block(x, w, b, gamma, beta, *, num_groups=8, eps=1e-5, skip=None):
    B, Cin, H, Wd = x.shape
    Cout = w.shape[0]
    assert Cout % num_groups == 0
    g = Cout // num_groups
    HW = H * Wd
    # TODO(synk): pad groups / HW when g % 8 != 0 or HW % 128 != 0.
    assert g % 8 == 0 and HW % 128 == 0

    xf = x.reshape(B, Cin, HW).astype(jnp.bfloat16)      # free reshape; bf16 halves DMA
    w16 = w.astype(jnp.bfloat16)
    b3 = b.reshape(num_groups, g, 1).astype(jnp.float32)
    gamma3 = gamma.reshape(num_groups, g, 1).astype(jnp.float32)
    beta3 = beta.reshape(num_groups, g, 1).astype(jnp.float32)

    common_in_specs = [
        pl.BlockSpec((1, Cin, HW), lambda bi: (bi, 0, 0)),           # per-batch activations
        pl.BlockSpec((Cout, Cin), lambda bi: (0, 0)),                # full weight, resident
        pl.BlockSpec((num_groups, g, 1), lambda bi: (0, 0, 0)),      # conv bias
        pl.BlockSpec((num_groups, g, 1), lambda bi: (0, 0, 0)),      # GN gamma
        pl.BlockSpec((num_groups, g, 1), lambda bi: (0, 0, 0)),      # GN beta
    ]
    cparams = pltpu.CompilerParams(dimension_semantics=("parallel",))

    if skip is None:
        kernel = functools.partial(_fpn_kernel, num_groups=num_groups,
                                   eps=float(eps), inv_n=1.0 / float(g * HW))
        cost = pl.CostEstimate(
            flops=2 * B * Cout * Cin * HW,
            transcendentals=B * num_groups,
            bytes_accessed=(B * Cin * HW * 2 + Cout * Cin * 2 + 3 * Cout * 4
                            + B * Cout * HW * 4))
        y = pl.pallas_call(
            kernel,
            out_shape=jax.ShapeDtypeStruct((B, Cout, HW), jnp.float32),
            grid_spec=pltpu.PrefetchScalarGridSpec(
                num_scalar_prefetch=0,
                grid=(B,),
                in_specs=common_in_specs,
                out_specs=pl.BlockSpec((1, Cout, HW), lambda bi: (bi, 0, 0)),
            ),
            compiler_params=cparams,
            cost_estimate=cost,
        )(xf, w16, b3, gamma3, beta3)
        return y.reshape(B, Cout, H, Wd)

    # --- fused upsample + skip path ---
    Hout, Wout = int(skip.shape[-2]), int(skip.shape[-1])
    HWout = Hout * Wout
    K = jnp.asarray(_resize_kron(Hout, Wout, H, Wd), dtype=jnp.bfloat16)   # (HW, HWout)
    skip_f = skip.reshape(B, Cout, HWout).astype(jnp.float32)

    kernel = functools.partial(_fpn_skip_kernel, num_groups=num_groups,
                               eps=float(eps), inv_n=1.0 / float(g * HW))
    cost = pl.CostEstimate(
        flops=2 * B * Cout * Cin * HW + 2 * B * Cout * HW * HWout,
        transcendentals=B * num_groups,
        bytes_accessed=(B * Cin * HW * 2 + Cout * Cin * 2 + 3 * Cout * 4
                        + HW * HWout * 2 + B * Cout * HWout * 4
                        + B * Cout * HWout * 4))
    out = pl.pallas_call(
        kernel,
        out_shape=jax.ShapeDtypeStruct((B, Cout, HWout), jnp.float32),
        grid_spec=pltpu.PrefetchScalarGridSpec(
            num_scalar_prefetch=0,
            grid=(B,),
            in_specs=common_in_specs + [
                pl.BlockSpec((HW, HWout), lambda bi: (0, 0)),            # kron resize matrix
                pl.BlockSpec((1, Cout, HWout), lambda bi: (bi, 0, 0)),   # skip
            ],
            out_specs=pl.BlockSpec((1, Cout, HWout), lambda bi: (bi, 0, 0)),
        ),
        compiler_params=cparams,
        cost_estimate=cost,
    )(xf, w16, b3, gamma3, beta3, K, skip_f)
    return out.reshape(B, Cout, Hout, Wout)


if __name__ == "__main__":
    # Small FPN-ish shapes: 32 -> 64 channels (8 groups of 8), 16x16 feature
    # map, skip connection at 32x32, batch 2.
    B, Cin, Cout, H, W = 2, 32, 64, 16, 16
    GROUPS = 8
    Hs, Ws = 32, 32
    EPS = 1e-5

    key = jax.random.PRNGKey(0)
    kx, kw, kb, kg, kbe, ks = jax.random.split(key, 6)
    x = jax.random.normal(kx, (B, Cin, H, W), jnp.float32)
    w = jax.random.normal(kw, (Cout, Cin), jnp.float32) * (1.0 / Cin) ** 0.5
    b = 0.1 * jax.random.normal(kb, (Cout,), jnp.float32)
    gamma = 1.0 + 0.1 * jax.random.normal(kg, (Cout,), jnp.float32)
    beta = 0.1 * jax.random.normal(kbe, (Cout,), jnp.float32)
    skip = jax.random.normal(ks, (B, Cout, Hs, Ws), jnp.float32)

    out_plain = jax.block_until_ready(
        fpn_block(x, w, b, gamma, beta, num_groups=GROUPS, eps=EPS))
    out_skip = jax.block_until_ready(
        fpn_block(x, w, b, gamma, beta, num_groups=GROUPS, eps=EPS, skip=skip))

    hi = lax.Precision.HIGHEST

    # Reference 1 (conv + GN + ReLU): PyTorch semantics, precision-matched to
    # the kernel's bf16 MXU operands / f32 accumulation (the only deviation
    # from the pure-f32 PyTorch module is bf16 operand rounding).
    x16 = x.astype(jnp.bfloat16).astype(jnp.float32)
    w16 = w.astype(jnp.bfloat16).astype(jnp.float32)
    y = jnp.einsum('oc,bchw->bohw', w16, x16, precision=hi) + b[None, :, None, None]
    yg = y.reshape(B, GROUPS, Cout // GROUPS, H, W)
    mean = yg.mean(axis=(2, 3, 4), keepdims=True)
    var = yg.var(axis=(2, 3, 4), keepdims=True)
    yn = (yg - mean) / jnp.sqrt(var + EPS)
    ref1 = jnp.maximum(
        yn.reshape(B, Cout, H, W) * gamma[None, :, None, None]
        + beta[None, :, None, None], 0.0)

    # Reference 2 (fused bilinear upsample + skip add): resize the
    # independently-validated conv/GN/ReLU output with the same bf16-rounded
    # kron matrix, isolating the fused epilogue.
    K16 = jnp.asarray(_resize_kron(Hs, Ws, H, W), dtype=jnp.bfloat16).astype(jnp.float32)
    a16 = out_plain.reshape(B, Cout, H * W).astype(jnp.bfloat16).astype(jnp.float32)
    ref2 = (jnp.einsum('bcp,pq->bcq', a16, K16, precision=hi)
            .reshape(B, Cout, Hs, Ws) + skip)

    assert out_plain.shape == (B, Cout, H, W)
    assert out_skip.shape == (B, Cout, Hs, Ws)
    err1 = float(jnp.max(jnp.abs(out_plain - ref1)))
    err2 = float(jnp.max(jnp.abs(out_skip - ref2)))
    assert jnp.allclose(out_plain, ref1, atol=2e-3, rtol=2e-3), err1
    # Looser tol: covers a possible one-ulp bf16 re-rounding of the resident
    # activation between the two separately compiled kernels.
    assert jnp.allclose(out_skip, ref2, atol=2e-2, rtol=2e-2), err2
    print("KERNEL_OK")
</pallas_src>

<mosaic_0001>
module attributes {stable_mosaic.version = 11 : i64} {
  func.func @_fpn_kernel(%arg0: i32, %arg1: memref<1x32x256xbf16, #tpu.memory_space<vmem>>, %arg2: memref<64x32xbf16, #tpu.memory_space<vmem>>, %arg3: memref<8x8x1xf32, #tpu.memory_space<vmem>>, %arg4: memref<8x8x1xf32, #tpu.memory_space<vmem>>, %arg5: memref<8x8x1xf32, #tpu.memory_space<vmem>>, %arg6: memref<1x64x256xf32, #tpu.memory_space<vmem>>) attributes {dimension_semantics = [#tpu.dimension_semantics<parallel>], iteration_bounds = array<i64: 2>, scalar_prefetch = 0 : i64, scratch_operands = 0 : i64, tpu.core_type = #tpu.core_type<tc>, window_params = [{transform_indices = @transform_0, window_bounds = array<i64: 1, 32, 256>}, {pipeline_mode = #tpu.pipeline_mode<synchronous>, transform_indices = @transform_1, window_bounds = array<i64: 64, 32>}, {pipeline_mode = #tpu.pipeline_mode<synchronous>, transform_indices = @transform_2, window_bounds = array<i64: 8, 8, 1>}, {pipeline_mode = #tpu.pipeline_mode<synchronous>, transform_indices = @transform_3, window_bounds = array<i64: 8, 8, 1>}, {pipeline_mode = #tpu.pipeline_mode<synchronous>, transform_indices = @transform_4, window_bounds = array<i64: 8, 8, 1>}, {transform_indices = @transform_5, window_bounds = array<i64: 1, 64, 256>}]} {
    %c0 = arith.constant 0 : index
    %c0_0 = arith.constant 0 : index
    %c0_1 = arith.constant 0 : index
    %0 = vector.load %arg1[%c0, %c0_0, %c0_1] : memref<1x32x256xbf16, #tpu.memory_space<vmem>>, vector<1x32x256xbf16>
    %1 = vector.shape_cast %0 : vector<1x32x256xbf16> to vector<32x256xbf16>
    %c0_2 = arith.constant 0 : index
    %c0_3 = arith.constant 0 : index
    %2 = vector.load %arg2[%c0_2, %c0_3] : memref<64x32xbf16, #tpu.memory_space<vmem>>, vector<64x32xbf16>
    %cst = arith.constant dense<0.000000e+00> : vector<64x256xf32>
    %3 = tpu.matmul %2, %1, %cst {dimension_numbers = #tpu.dot_dimension_numbers<[1], [0], [0], [1], [0, 0, 1, 1], [], []>} : vector<64x32xbf16>, vector<32x256xbf16>, vector<64x256xf32> -> vector<64x256xf32>
    %4 = vector.shape_cast %3 : vector<64x256xf32> to vector<8x8x256xf32>
    %c0_4 = arith.constant 0 : index
    %c0_5 = arith.constant 0 : index
    %c0_6 = arith.constant 0 : index
    %5 = vector.load %arg3[%c0_4, %c0_5, %c0_6] : memref<8x8x1xf32, #tpu.memory_space<vmem>>, vector<8x8x1xf32>
    %6 = vector.broadcast %5 : vector<8x8x1xf32> to vector<8x8x256xf32>
    %7 = arith.addf %4, %6 : vector<8x8x256xf32>
    %cst_7 = arith.constant dense<0.000000e+00> : vector<8x8xf32>
    %8 = vector.multi_reduction <add>, %7, %cst_7 [2] : vector<8x8x256xf32> to vector<8x8xf32>
    %9 = vector.shape_cast %8 : vector<8x8xf32> to vector<8x8x1xf32>
    %cst_8 = arith.constant dense<0.000000e+00> : vector<8x1xf32>
    %10 = vector.multi_reduction <add>, %9, %cst_8 [1] : vector<8x8x1xf32> to vector<8x1xf32>
    %11 = vector.shape_cast %10 : vector<8x1xf32> to vector<8x1x1xf32>
    %cst_9 = arith.constant 4.8828125E-4 : f32
    %12 = vector.broadcast %cst_9 : f32 to vector<8x1x1xf32>
    %13 = arith.mulf %11, %12 : vector<8x1x1xf32>
    %14 = vector.broadcast %13 : vector<8x1x1xf32> to vector<8x8x256xf32>
    %15 = arith.subf %7, %14 : vector<8x8x256xf32>
    %16 = arith.mulf %15, %15 : vector<8x8x256xf32>
    %cst_10 = arith.constant dense<0.000000e+00> : vector<8x8xf32>
    %17 = vector.multi_reduction <add>, %16, %cst_10 [2] : vector<8x8x256xf32> to vector<8x8xf32>
    %18 = vector.shape_cast %17 : vector<8x8xf32> to vector<8x8x1xf32>
    %cst_11 = arith.constant dense<0.000000e+00> : vector<8x1xf32>
    %19 = vector.multi_reduction <add>, %18, %cst_11 [1] : vector<8x8x1xf32> to vector<8x1xf32>
    %20 = vector.shape_cast %19 : vector<8x1xf32> to vector<8x1x1xf32>
    %cst_12 = arith.constant 4.8828125E-4 : f32
    %21 = vector.broadcast %cst_12 : f32 to vector<8x1x1xf32>
    %22 = arith.mulf %20, %21 : vector<8x1x1xf32>
    %cst_13 = arith.constant 9.99999974E-6 : f32
    %23 = vector.broadcast %cst_13 : f32 to vector<8x1x1xf32>
    %24 = arith.addf %22, %23 : vector<8x1x1xf32>
    %25 = math.rsqrt %24 : vector<8x1x1xf32>
    %c0_14 = arith.constant 0 : index
    %c0_15 = arith.constant 0 : index
    %c0_16 = arith.constant 0 : index
    %26 = vector.load %arg4[%c0_14, %c0_15, %c0_16] : memref<8x8x1xf32, #tpu.memory_space<vmem>>, vector<8x8x1xf32>
    %27 = vector.broadcast %25 : vector<8x1x1xf32> to vector<8x8x1xf32>
    %28 = arith.mulf %27, %26 : vector<8x8x1xf32>
    %29 = vector.broadcast %28 : vector<8x8x1xf32> to vector<8x8x256xf32>
    %30 = arith.mulf %15, %29 : vector<8x8x256xf32>
    %c0_17 = arith.constant 0 : index
    %c0_18 = arith.constant 0 : index
    %c0_19 = arith.constant 0 : index
    %31 = vector.load %arg5[%c0_17, %c0_18, %c0_19] : memref<8x8x1xf32, #tpu.memory_space<vmem>>, vector<8x8x1xf32>
    %32 = vector.broadcast %31 : vector<8x8x1xf32> to vector<8x8x256xf32>
    %33 = arith.addf %30, %32 : vector<8x8x256xf32>
    %cst_20 = arith.constant 0.000000e+00 : f32
    %34 = vector.broadcast %cst_20 : f32 to vector<8x8x256xf32>
    %35 = arith.maximumf %33, %34 : vector<8x8x256xf32>
    %36 = vector.shape_cast %35 : vector<8x8x256xf32> to vector<64x256xf32>
    %c0_21 = arith.constant 0 : index
    %c0_22 = arith.constant 0 : index
    %c0_23 = arith.constant 0 : index
    %37 = vector.load %arg6[%c0_21, %c0_22, %c0_23] : memref<1x64x256xf32, #tpu.memory_space<vmem>>, vector<1x64x256xf32>
    %38 = vector.shape_cast %37 : vector<1x64x256xf32> to vector<64x256xf32>
    %39 = vector.shape_cast %36 : vector<64x256xf32> to vector<1x64x256xf32>
    tpu.vector_store %arg6[%c0_21, %c0_22, %c0_23], %39 {strides = array<i32>} : memref<1x64x256xf32, #tpu.memory_space<vmem>>, vector<1x64x256xf32>,
    return
  }
  func.func @transform_0(%arg0: i32) -> (i32, i32, i32) {
    %c0_i32 = arith.constant 0 : i32
    %c0_i32_0 = arith.constant 0 : i32
    %c0_i32_1 = arith.constant 0 : i32
    return %arg0, %c0_i32, %c0_i32_0 : i32, i32, i32
  }
  func.func @transform_1(%arg0: i32) -> (i32, i32) {
    %c0_i32 = arith.constant 0 : i32
    %c0_i32_0 = arith.constant 0 : i32
    %c0_i32_1 = arith.constant 0 : i32
    return %c0_i32, %c0_i32_0 : i32, i32
  }
  func.func @transform_2(%arg0: i32) -> (i32, i32, i32) {
    %c0_i32 = arith.constant 0 : i32
    %c0_i32_0 = arith.constant 0 : i32
    %c0_i32_1 = arith.constant 0 : i32
    %c0_i32_2 = arith.constant 0 : i32
    return %c0_i32, %c0_i32_0, %c0_i32_1 : i32, i32, i32
  }
  func.func @transform_3(%arg0: i32) -> (i32, i32, i32) {
    %c0_i32 = arith.constant 0 : i32
    %c0_i32_0 = arith.constant 0 : i32
    %c0_i32_1 = arith.constant 0 : i32
    %c0_i32_2 = arith.constant 0 : i32
    return %c0_i32, %c0_i32_0, %c0_i32_1 : i32, i32, i32
  }
  func.func @transform_4(%arg0: i32) -> (i32, i32, i32) {
    %c0_i32 = arith.constant 0 : i32
    %c0_i32_0 = arith.constant 0 : i32
    %c0_i32_1 = arith.constant 0 : i32
    %c0_i32_2 = arith.constant 0 : i32
    return %c0_i32, %c0_i32_0, %c0_i32_1 : i32, i32, i32
  }
  func.func @transform_5(%arg0: i32) -> (i32, i32, i32) {
    %c0_i32 = arith.constant 0 : i32
    %c0_i32_0 = arith.constant 0 : i32
    %c0_i32_1 = arith.constant 0 : i32
    return %arg0, %c0_i32, %c0_i32_0 : i32, i32, i32
  }
}

</mosaic_0001>

<bundles_post_ra>
// kernel: tpu_custom_call.1
= control target key start
LH: loop header
LB: loop body
LE: loop exit
PB: predicated region body
PF: predicated region fallthrough
CT: control target
= control target key end

     0   :  { %10 = vsyncpa [#allocation3], 0  ;;  %s1537_s0 = inlined_call_operand.vmem [shape: bf16[2,32,256], index: 0, kind: input, shape index: {}]   ;;  %s1538_s1 = inlined_call_operand.vmem [shape: bf16[64,32], index: 1, kind: input, shape index: {}]   ;;  %s1539_s2 = inlined_call_operand.vmem [shape: f32[8,8,1], index: 2, kind: input, shape index: {}]   ;;  %s1540_s3 = inlined_call_operand.vmem [shape: f32[8,8,1], index: 3, kind: input, shape index: {}]   ;;  %s1541_s4 = inlined_call_operand.vmem [shape: f32[8,8,1], index: 4, kind: input, shape index: {}]   ;;  %s1542_s5 = inlined_call_operand.hbm [shape: f32[2,64,256], index: 5, kind: output, shape index: {}]  }
   0x1   :  { %12 = vsyncpa [#allocation3 + $0x1], 0  ;;  %s1161_s18 = smov 0   ;;  %s1163_s19 = smov 0  }
   0x2   :  { %s1165_s20 = smov 0   ;;  %s1167_s21 = smov 0  }
   0x3 LB: > { %s1182_s22 = sadd.s32 4294967295, %s1126_s21   ;;  %s937_s23 = sadd.s32 4294967294, %s1126_s21   ;;  %s1126_s21 = sphi %s1167_s21, %s1548_s21   ;;  %s1122_s20 = sphi %s1165_s20, %s1547_s20   ;;  %s1118_s19 = sphi %s1163_s19, %s1546_s19   ;;  %s1114_s18 = sphi %s1161_s18, %s1545_s18  }
   0x4   : > { %s1186_s24 = sadd.s32 1, %s1126_s21   ;;  %s135_s25 = sadd.s32 1, %s1122_s20 }
   0x5   : > { %s132_s26 = ssub.s32 %s1126_s21, %s1186_s24  ;;  %p145_p0 = scmp.ne.s32.totalorder %s1122_s20, %s1118_s19 }
   0x6   : > { %p133_p1 = scmp.eq.s32.totalorder %s132_s26, 0  ;;  %p146_p2 = scmp.eq.s32.totalorder %s1182_s22, 1 }
   0x7   : > { %p151_p3 = scmp.ne.s32.totalorder %s1118_s19, %s1114_s18  ;;  %p152_p4 = scmp.eq.s32.totalorder %s937_s23, 1 }
   0x8   : > { %s1197_s27 = scalar_select %p133_p1, %s1122_s20, %s135_s25  }
   0x9   : > { %p1199_p5 = por %p146_p2, %p145_p0  ;;  %p1203_p6 = por %p152_p4, %p151_p3 }
   0xa   : > { %p940_p7 = scmp.ge.s32.totalorder %s1126_s21, 1  ;;  %p190_p8 = scmp.lt.s32.totalorder %s1126_s21, 3 }
   0xc   : > { %p191_p9 = pnand %p940_p7, %p190_p8 }
   0xd   : > { %p218_p10 = scmp.lt.s32.totalorder (!%p191_p9), %s1182_s22, 1  ;;  %s215_s23 = sand.u32 (!%p191_p9), 1, %s1118_s19  }
   0xe   : > { %194 = sbr.rel (%p191_p9) target bundleno = 619 (0x26b), region = 40  ;;  %s941_s25 = sshll.u32 (!%p191_p9), %s215_s23, 7 }
   0xf   : > { %s1471_s26 = scalar_lea.vmem (!%p191_p9), [#allocation2], %s941_s25  ;;  %s998_s30 = sshll.u32 (!%p191_p9), %s1182_s22, 7 }
  0x10   : > { %s871_s8 = scalar_lea.hbm (!%p191_p9), %s1542_s5, %s998_s30  ;;  %s860_s10 = scalar_lea.sflag (!%p191_p9), [#allocation3], %s215_s23 }
  0x13   : > { %v347_v0 = vld [vmem:[%s1539_s2] sm:$0xff]  ;;  %v1128_v1 = vmov 0   ;;  %v349_v2 = vld [vmem:[%s1539_s2 + $0x10] sm:$0xff]  ;;  %s219_s9 = scalar_select %p218_p10, %s1182_s22, 1  ;;  %v348_v7 = vld [vmem:[%s1539_s2 + $0x8] sm:$0xff]  ;;  %vm276_vm0 = vcmask 261120  }
  0x14   : > { %1045 = vset.pattern.permute.xlu0 %v1128_v1  ;;  %1046 = vset.pattern.permute.xlu1 %v1128_v1  ;;  %v351_v3 = vld [vmem:[%s1539_s2 + $0x20] sm:$0xff]  ;;  %v350_v15 = vld [vmem:[%s1539_s2 + $0x18] sm:$0xff]  ;;  %v352_v17 = vld [vmem:[%s1539_s2 + $0x28] sm:$0xff]  ;;  %s872_s22 = sshll.u32 %s1471_s26, 4  ;;  %s873_s22 = int_to_ptr.vmem [resolvable:$true] %s872_s22 }
  0x15   : > { %357 = vperm.xlu0 %1045, %v347_v0   ;;  %367 = vperm.xlu1 %1046, %v349_v2   ;;  %s989_s12 = sshll.u32 %s219_s9, 5  ;;  %v994_v19 = vld [vmem:[%s1538_s1] sm:$0xff]  ;;  %v996_v20 = vld [vmem:[%s1538_s1 + $0x10] sm:$0xff]  ;;  %v354_v22 = vld [vmem:[%s1539_s2 + $0x38] sm:$0xff]  ;;  %s874_s9 = sshll.u32 %s871_s8, 4  ;;  %s875_s9 = int_to_ptr.hbm [resolvable:$true] %s874_s9 }
  0x16   : > { %1047 = vset.pattern.permute.xlu2 %v1128_v1  ;;  %s222_s15 = scalar_lea.vmem %s1537_s0, %s989_s12  ;;  %v353_v21 = vld [vmem:[%s1539_s2 + $0x30] sm:$0xff]  ;;  %v995_v23 = vld [vmem:[%s1538_s1 + $0x8] sm:$0xff]  ;;  %v997_v24 = vld [vmem:[%s1538_s1 + $0x18] sm:$0xff]  ;;  %s1078_s11 = sshra.s32 %s875_s9, 4  ;;  %s1079_s11 = int_to_ptr.hbm [resolvable:$true] %s1078_s11 }
  0x17   : > { %377 = vperm.xlu2 %1047, %v351_v3   ;;  %v970_v4 = vld [vmem:[%s222_s15 + $0x10] sm:$0xf]  ;;  %v993_v5 = vld [vmem:[%s222_s15 + $0x14] sm:$0xf0]  ;;  %v992_v6 = vld [vmem:[%s222_s15 + $0x14] sm:$0xf]  ;;  %p1085_p0 = scmp.lt.s32.totalorder %s1079_s11, %s1542_s5 }
  0x18   : > { %v971_v8 = vor.u32 %v993_v5, %v970_v4  ;;  %v972_v9 = vld [vmem:[%s222_s15 + $0x18] sm:$0xf0]  ;;  %v962_v10 = vld [vmem:[%s222_s15] sm:$0xf]  ;;  %v991_v11 = vld [vmem:[%s222_s15 + $0x4] sm:$0xf0] }
  0x19   : > { %v975_v12 = vor.u32 %v992_v6, %v972_v9  ;;  %v990_v13 = vld [vmem:[%s222_s15 + $0x4] sm:$0xf]  ;;  %v964_v14 = vld [vmem:[%s222_s15 + $0x8] sm:$0xf0]  ;;  %v963_v16 = vor.u32 %v991_v11, %v962_v10  ;;  %s1080_s12 = scalar_lea.hbm %s1079_s11, 128  ;;  %s1084_s15 = scalar_lea.hbm %s1542_s5, 256 }
  0x1a   : > { %295 = vmatpush.bf16.msra.mxu0 %v971_v8  ;;  %999 = vmatpush.bf16.msra.mxu2 %v971_v8  ;;  %v967_v18 = vor.u32 %v990_v13, %v964_v14  ;;  %p1081_p11 = scmp.ne.s32.totalorder %s1079_s11, %s1080_s12  ;;  %p1086_p1 = scmp.lt.s32.totalorder %s1084_s15, %s1080_s12 }
  0x1b   : > { %324 = vmatpush.bf16.msra.mxu1 %v975_v12  ;;  %1001 = vmatpush.bf16.msra.mxu3 %v975_v12 }
  0x1c   : > { %p1082_p12 = pnand %p1081_p11, %p1199_p5  ;;  %p1087_p2 = por %p1086_p1, %p1085_p0 }
  0x1d   : > { %362 = vperm.xlu0 %1045, %v348_v7   ;;  %372 = vperm.xlu1 %1046, %v350_v15  }
  0x1e   : > { %296 = vmatpush.bf16.msra.mxu0 %v963_v16  ;;  %1000 = vmatpush.bf16.msra.mxu2 %v963_v16  ;;  %p1083_p13 = pneg %p1082_p12 }
  0x1f   : > { %382 = vperm.xlu2 %1047, %v352_v17   ;;  %325 = vmatpush.bf16.msra.mxu1 %v967_v18 }
  0x20   : > { %1002 = vmatpush.bf16.msra.mxu3 %v967_v18  ;;  %p1088_p3 = pnand %p1087_p2, %p1083_p13 }
  0x21   : > { %976 = vmatmul.msk.bf16.vlgmr.msra.gmra.mxu0 %vm276_vm0, %v994_v19  ;;  %978 = vmatmul.msk.bf16.vlgmr.msra.gmra.mxu2 %vm276_vm0, %v996_v20 }
  0x22   : > { %980 = vmatmul.msk.bf16.vlgmr.msra.gmra.mxu1 %vm276_vm0, %v994_v19 }
  0x23   : > { %982 = vmatmul.msk.bf16.vlgmr.msra.gmra.mxu3 %vm276_vm0, %v996_v20 }
  0x25   : > { %387 = vperm.xlu0 %1045, %v353_v21   ;;  %392 = vperm.xlu1 %1046, %v354_v22  }
  0x31   : > { %977 = vmatmul.msk.bf16.gmra.mxu0 %vm276_vm0, %v995_v23  ;;  %979 = vmatmul.msk.bf16.gmra.mxu2 %vm276_vm0, %v997_v24 }
  0x32   : > { %981 = vmatmul.msk.bf16.gmra.mxu1 %vm276_vm0, %v995_v23 }
  0x33   : > { %983 = vmatmul.msk.bf16.gmra.mxu3 %vm276_vm0, %v997_v24 }
  0x71   : > { %v378_v31 = vpop.permute.xlu2 %377 }
  0x79   : > { %v383_v45 = vpop.permute.xlu2 %382 }
  0x87   : > { %v358_v25 = vpop.permute.xlu0 %357  ;;  %v368_v42 = vpop.permute.xlu1 %367 }
  0x8f   : > { %v363_v35 = vpop.permute.xlu0 %362  ;;  %v373_v55 = vpop.permute.xlu1 %372 }
  0x97   : > { %v388_v57 = vpop.permute.xlu0 %387  ;;  %v393_v4 = vpop.permute.xlu1 %392 }
  0x9e   : > { %v298_v26 = vpop.f32.mrf.mxu0 }
  0x9f   : > { %v1258_v27 = vadd.f32 %v358_v25, %v298_v26  ;;  %v327_v28 = vpop.f32.mrf.mxu1 }
  0xa0   : > { %v1260_v29 = vadd.f32 %v358_v25, %v327_v28 }
  0xa2   : > { %v411_v30 = vadd.f32 %v1260_v29, %v1258_v27 }
  0xa4   : > { %412 = vadd.xlane.f32.xlu2 %v411_v30  ;;  %v308_v32 = vpop.f32.mrf.mxu2 }
  0xa5   : > { %v1264_v33 = vadd.f32 %v378_v31, %v308_v32 }
  0xa6   : > { %v337_v34 = vpop.f32.mrf.mxu3  ;;  %v300_v37 = vpop.f32.mrf.mxu0 }
  0xa7   : > { %v1266_v36 = vadd.f32 %v378_v31, %v337_v34  ;;  %v1268_v38 = vadd.f32 %v363_v35, %v300_v37  ;;  %v329_v39 = vpop.f32.mrf.mxu1 }
  0xa8   : > { %v1270_v40 = vadd.f32 %v363_v35, %v329_v39 }
  0xa9   : > { %v423_v41 = vadd.f32 %v1266_v36, %v1264_v33 }
  0xaa   : > { %v414_v43 = vadd.f32 %v1270_v40, %v1268_v38 }
  0xac   : > { %424 = vadd.xlane.f32.xlu2 %v423_v41  ;;  %415 = vadd.xlane.f32.xlu0 %v414_v43  ;;  %v310_v44 = vpop.f32.mrf.mxu2 }
  0xad   : > { %v1276_v47 = vadd.f32 %v383_v45, %v310_v44 }
  0xae   : > { %v339_v46 = vpop.f32.mrf.mxu3  ;;  %v303_v49 = vpop.f32.mrf.mxu0 }
  0xaf   : > { %v1278_v48 = vadd.f32 %v383_v45, %v339_v46  ;;  %v1280_v50 = vadd.f32 %v368_v42, %v303_v49  ;;  %v332_v51 = vpop.f32.mrf.mxu1 }
  0xb0   : > { %v1282_v52 = vadd.f32 %v368_v42, %v332_v51 }
  0xb1   : > { %v426_v53 = vadd.f32 %v1278_v48, %v1276_v47 }
  0xb2   : > { %v417_v54 = vadd.f32 %v1282_v52, %v1280_v50 }
  0xb4   : > { %427 = vadd.xlane.f32.xlu0 %v426_v53  ;;  %418 = vadd.xlane.f32.xlu1 %v417_v54  ;;  %v313_v56 = vpop.f32.mrf.mxu2 }
  0xb5   : > { %v1288_v59 = vadd.f32 %v388_v57, %v313_v56 }
  0xb6   : > { %v342_v58 = vpop.f32.mrf.mxu3  ;;  %v305_v61 = vpop.f32.mrf.mxu0 }
  0xb7   : > { %v1290_v60 = vadd.f32 %v388_v57, %v342_v58  ;;  %v1292_v62 = vadd.f32 %v373_v55, %v305_v61  ;;  %v334_v63 = vpop.f32.mrf.mxu1 }
  0xb8   : > { %v1294_v0 = vadd.f32 %v373_v55, %v334_v63 }
  0xb9   : > { %v429_v1 = vadd.f32 %v1290_v60, %v1288_v59 }
  0xba   : > { %v420_v2 = vadd.f32 %v1294_v0, %v1292_v62 }
  0xbc   : > { %430 = vadd.xlane.f32.xlu1 %v429_v1  ;;  %421 = vadd.xlane.f32.xlu2 %v420_v2  ;;  %v315_v3 = vpop.f32.mrf.mxu2 }
  0xbd   : > { %v1300_v6 = vadd.f32 %v393_v4, %v315_v3 }
  0xbe   : > { %v344_v5 = vpop.f32.mrf.mxu3 }
  0xbf   : > { %v1302_v7 = vadd.f32 %v393_v4, %v344_v5 }
  0xc1   : > { %v432_v8 = vadd.f32 %v1302_v7, %v1300_v6 }
  0xc4   : > { %433 = vadd.xlane.f32.xlu2 %v432_v8 }
 0x117   : > { %v413_v9 = vpop.xlane.xlu2 %412 }
 0x118   : > { %v435_v10 = vrot.slane %v413_v9, 4 }
 0x11a   : > { %v436_v11 = vadd.f32 %v435_v10, %v413_v9 }
 0x11c   : > { %v437_v12 = vrot.slane %v436_v11, 2 }
 0x11e   : > { %v438_v13 = vadd.f32 %v437_v12, %v436_v11 }
 0x11f   : > { %v425_v14 = vpop.xlane.xlu2 %424  ;;  %v416_v15 = vpop.xlane.xlu0 %415 }
 0x120   : > { %v439_v16 = vrot.slane %v438_v13, 1  ;;  %v459_v17 = vrot.slane %v425_v14, 4  ;;  %v441_v18 = vrot.slane %v416_v15, 4 }
 0x122   : > { %v440_v19 = vadd.f32 %v439_v16, %v438_v13  ;;  %v460_v20 = vadd.f32 %v459_v17, %v425_v14  ;;  %v442_v21 = vadd.f32 %v441_v18, %v416_v15 }
 0x124   : > { %v483_v22 = vmul.f32 0.00048828125, %v440_v19  ;;  %v461_v23 = vrot.slane %v460_v20, 2  ;;  %v443_v24 = vrot.slane %v442_v21, 2 }
 0x126   : > { %v462_v25 = vadd.f32 %v461_v23, %v460_v20  ;;  %v444_v26 = vadd.f32 %v443_v24, %v442_v21  ;;  %v1307_v28 = vsub.f32 %v1258_v27, %v483_v22  ;;  %v1310_v30 = vsub.f32 %v1260_v29, %v483_v22 }
 0x127   : > { %v428_v31 = vpop.xlane.xlu0 %427  ;;  %v419_v32 = vpop.xlane.xlu1 %418 }
 0x128   : > { %v463_v34 = vrot.slane %v462_v25, 1  ;;  %v445_v35 = vrot.slane %v444_v26, 1  ;;  %v465_v37 = vrot.slane %v428_v31, 4  ;;  %v447_v39 = vrot.slane %v419_v32, 4 }
 0x129   : > { %v507_v41 = vmul.f32 %v1307_v28, %v1307_v28  ;;  %v508_v42 = vmul.f32 %v1310_v30, %v1310_v30 }
 0x12a   : > { %v464_v43 = vadd.f32 %v463_v34, %v462_v25  ;;  %v466_v44 = vadd.f32 %v465_v37, %v428_v31  ;;  %v448_v45 = vadd.f32 %v447_v39, %v419_v32  ;;  %v446_v27 = vadd.f32 %v445_v35, %v444_v26 }
 0x12b   : > { %v523_v46 = vadd.f32 %v508_v42, %v507_v41 }
 0x12c   : > { %v487_v49 = vmul.f32 0.00048828125, %v464_v43  ;;  %v467_v29 = vrot.slane %v466_v44, 2  ;;  %v449_v51 = vrot.slane %v448_v45, 2  ;;  %v484_v57 = vmul.f32 0.00048828125, %v446_v27 }
 0x12d   : > { %524 = vadd.xlane.f32.xlu0 %v523_v46 }
 0x12e   : > { %v468_v53 = vadd.f32 %v467_v29, %v466_v44  ;;  %v450_v54 = vadd.f32 %v449_v51, %v448_v45  ;;  %v1317_v55 = vsub.f32 %v1264_v33, %v487_v49  ;;  %v1320_v56 = vsub.f32 %v1266_v36, %v487_v49 }
 0x12f   : > { %v431_v58 = vpop.xlane.xlu1 %430  ;;  %v422_v61 = vpop.xlane.xlu2 %421  ;;  %v1327_v36 = vsub.f32 %v1268_v38, %v484_v57  ;;  %v1330_v12 = vsub.f32 %v1270_v40, %v484_v57 }
 0x130   : > { %v469_v63 = vrot.slane %v468_v53, 1  ;;  %v451_v1 = vrot.slane %v450_v54, 1  ;;  %v471_v2 = vrot.slane %v431_v58, 4  ;;  %v453_v3 = vrot.slane %v422_v61, 4 }
 0x131   : > { %v515_v4 = vmul.f32 %v1317_v55, %v1317_v55  ;;  %v516_v5 = vmul.f32 %v1320_v56, %v1320_v56  ;;  %v509_v38 = vmul.f32 %v1327_v36, %v1327_v36  ;;  %v510_v40 = vmul.f32 %v1330_v12, %v1330_v12 }
 0x132   : > { %v452_v8 = vadd.f32 %v451_v1, %v450_v54  ;;  %v472_v9 = vadd.f32 %v471_v2, %v431_v58  ;;  %v454_v33 = vadd.f32 %v453_v3, %v422_v61  ;;  %v470_v10 = vadd.f32 %v469_v63, %v468_v53  ;;  %v765_v3 = vld [vmem:[%s1541_s4 + $0x10] sm:$0xff] }
 0x133   : > { %v535_v11 = vadd.f32 %v516_v5, %v515_v4  ;;  %v526_v32 = vadd.f32 %v510_v40, %v509_v38  ;;  %v767_v4 = vld [vmem:[%s1541_s4 + $0x20] sm:$0xff]  ;;  %v766_v5 = vld [vmem:[%s1541_s4 + $0x18] sm:$0xff] }
 0x134   : > { %v485_v13 = vmul.f32 0.00048828125, %v452_v8  ;;  %v473_v14 = vrot.slane %v472_v9, 2  ;;  %v455_v15 = vrot.slane %v454_v33, 2  ;;  %v488_v20 = vmul.f32 0.00048828125, %v470_v10 }
 0x135   : > { %536 = vadd.xlane.f32.xlu1 %v535_v11 }
 0x136   : > { %v474_v16 = vadd.f32 %v473_v14, %v472_v9  ;;  %v456_v17 = vadd.f32 %v455_v15, %v454_v33  ;;  %v1333_v18 = vsub.f32 %v1280_v50, %v485_v13  ;;  %v1336_v19 = vsub.f32 %v1282_v52, %v485_v13 }
 0x137   : > { %v434_v21 = vpop.xlane.xlu2 %433  ;;  %v1347_v35 = vsub.f32 %v1276_v47, %v488_v20  ;;  %v1350_v37 = vsub.f32 %v1278_v48, %v488_v20 }
 0x138   : > { %v475_v22 = vrot.slane %v474_v16, 1  ;;  %v457_v23 = vrot.slane %v456_v17, 1  ;;  %v477_v24 = vrot.slane %v434_v21, 4  ;;  %v511_v25 = vmul.f32 %v1333_v18, %v1333_v18 }
 0x139   : > { %v512_v50 = vmul.f32 %v1336_v19, %v1336_v19  ;;  %v517_v27 = vmul.f32 %v1347_v35, %v1347_v35  ;;  %v518_v47 = vmul.f32 %v1350_v37, %v1350_v37 }
 0x13a   : > { %v476_v26 = vadd.f32 %v475_v22, %v474_v16  ;;  %v458_v52 = vadd.f32 %v457_v23, %v456_v17  ;;  %v478_v31 = vadd.f32 %v477_v24, %v434_v21 }
 0x13b   : > { %v529_v34 = vadd.f32 %v512_v50, %v511_v25  ;;  %v538_v53 = vadd.f32 %v518_v47, %v517_v27 }
 0x13c   : > { %v489_v39 = vmul.f32 0.00048828125, %v476_v26  ;;  %v479_v41 = vrot.slane %v478_v31, 2  ;;  %v486_v42 = vmul.f32 0.00048828125, %v458_v52 }
 0x13d   : > { %527 = vadd.xlane.f32.xlu1 %v526_v32  ;;  %530 = vadd.xlane.f32.xlu2 %v529_v34 }
 0x13e   : > { %v480_v43 = vadd.f32 %v479_v41, %v478_v31  ;;  %v1353_v44 = vsub.f32 %v1288_v59, %v489_v39  ;;  %v1356_v45 = vsub.f32 %v1290_v60, %v489_v39  ;;  %v1367_v59 = vsub.f32 %v1292_v62, %v486_v42 }
 0x13f   : > { %v1370_v60 = vsub.f32 %v1294_v0, %v486_v42 }
 0x140   : > { %v481_v48 = vrot.slane %v480_v43, 1  ;;  %v519_v46 = vmul.f32 %v1353_v44, %v1353_v44  ;;  %v520_v49 = vmul.f32 %v1356_v45, %v1356_v45  ;;  %v513_v57 = vmul.f32 %v1367_v59, %v1367_v59 }
 0x141   : > { %v514_v58 = vmul.f32 %v1370_v60, %v1370_v60 }
 0x142   : > { %v482_v29 = vadd.f32 %v481_v48, %v480_v43  ;;  %v541_v51 = vadd.f32 %v520_v49, %v519_v46 }
 0x143   : > { %v532_v1 = vadd.f32 %v514_v58, %v513_v57 }
 0x144   : > { %v490_v54 = vmul.f32 0.00048828125, %v482_v29  ;;  %542 = vadd.xlane.f32.xlu0 %v541_v51 }
 0x145   : > { %539 = vadd.xlane.f32.xlu2 %v538_v53 }
 0x146   : > { %v1377_v61 = vsub.f32 %v1300_v6, %v490_v54  ;;  %v1380_v63 = vsub.f32 %v1302_v7, %v490_v54  ;;  %v764_v6 = vld [vmem:[%s1541_s4 + $0x8] sm:$0xff]  ;;  %v763_v7 = vld [vmem:[%s1541_s4] sm:$0xff] }
 0x148   : > { %v521_v62 = vmul.f32 %v1377_v61, %v1377_v61  ;;  %v522_v0 = vmul.f32 %v1380_v63, %v1380_v63 }
 0x14a   : > { %v544_v2 = vadd.f32 %v522_v0, %v521_v62 }
 0x14c   : > { %533 = vadd.xlane.f32.xlu0 %v532_v1  ;;  %545 = vadd.xlane.f32.xlu1 %v544_v2 }
 0x15d   : > { %783 = vperm.xlu2 %1047, %v765_v3  }
 0x160   : > { %778 = vperm.xlu0 %1045, %v764_v6  }
 0x165   : > { %773 = vperm.xlu1 %1046, %v763_v7  }
 0x168   : > { %793 = vperm.xlu0 %1045, %v767_v4  }
 0x16d   : > { %788 = vperm.xlu1 %1046, %v766_v5  }
 0x1a0   : > { %v525_v8 = vpop.xlane.xlu0 %524 }
 0x1a1   : > { %v547_v9 = vrot.slane %v525_v8, 4 }
 0x1a3   : > { %v548_v33 = vadd.f32 %v547_v9, %v525_v8 }
 0x1a5   : > { %v549_v10 = vrot.slane %v548_v33, 2 }
 0x1a7   : > { %v550_v11 = vadd.f32 %v549_v10, %v548_v33 }
 0x1a8   : > { %v537_v13 = vpop.xlane.xlu1 %536 }
 0x1a9   : > { %v551_v14 = vrot.slane %v550_v11, 1  ;;  %v571_v15 = vrot.slane %v537_v13, 4 }
 0x1ab   : > { %v552_v16 = vadd.f32 %v551_v14, %v550_v11  ;;  %v572_v17 = vadd.f32 %v571_v15, %v537_v13 }
 0x1ad   : > { %v595_v20 = vmul.f32 0.00048828125, %v552_v16  ;;  %v573_v21 = vrot.slane %v572_v17, 2 }
 0x1af   : > { %v603_v38 = vadd.f32 1e-05, %v595_v20  ;;  %v574_v40 = vadd.f32 %v573_v21, %v572_v17 }
 0x1b0   : > { %v528_v22 = vpop.xlane.xlu1 %527  ;;  %v531_v23 = vpop.xlane.xlu2 %530 }
 0x1b1   : > { %1048 = vrsqrt.f32 %v603_v38  ;;  %v575_v24 = vrot.slane %v574_v40, 1  ;;  %v553_v25 = vrot.slane %v528_v22, 4  ;;  %v559_v50 = vrot.slane %v531_v23, 4 }
 0x1b2   : > { %vm617_vm2 = vweird.f32 %v603_v38 }
 0x1b3   : > { %v576_v26 = vadd.f32 %v575_v24, %v574_v40  ;;  %v554_v52 = vadd.f32 %v553_v25, %v528_v22  ;;  %v560_v31 = vadd.f32 %v559_v50, %v531_v23  ;;  %v691_v40 = vld [vmem:[%s1540_s3] sm:$0xff] }
 0x1b5   : > { %v599_v32 = vmul.f32 0.00048828125, %v576_v26  ;;  %v555_v34 = vrot.slane %v554_v52, 2  ;;  %v561_v39 = vrot.slane %v560_v31, 2 }
 0x1b7   : > { %v1049_v41 = vpop.eup %1048  ;;  %v1401_v42 = vadd.f32 1e-05, %v599_v32  ;;  %v556_v43 = vadd.f32 %v555_v34, %v554_v52  ;;  %v562_v27 = vadd.f32 %v561_v39, %v560_v31  ;;  %v543_v47 = vpop.xlane.xlu0 %542 }
 0x1b8   : > { %v612_v48 = vmul.f32 %v1049_v41, %v603_v38  ;;  %v583_v46 = vrot.slane %v543_v47, 4  ;;  %v540_v49 = vpop.xlane.xlu2 %539  ;;  %vm618_vm1 = vweird.f32 %v1049_v41 }
 0x1b9   : > { %1050 = vrsqrt.f32 %v1401_v42  ;;  %v557_v29 = vrot.slane %v556_v43, 1  ;;  %v563_v51 = vrot.slane %v562_v27, 1  ;;  %v577_v53 = vrot.slane %v540_v49, 4  ;;  %vm619_vm3 = vmor %vm617_vm2, %vm618_vm1 }
 0x1ba   : > { %v584_v54 = vadd.f32 %v583_v46, %v543_v47  ;;  %v613_v57 = vmul.f32 %v1049_v41, %v612_v48  ;;  %vm657_vm5 = vweird.f32 %v1401_v42 }
 0x1bb   : > { %v558_v58 = vadd.f32 %v557_v29, %v556_v43  ;;  %v564_v62 = vadd.f32 %v563_v51, %v562_v27  ;;  %v578_v0 = vadd.f32 %v577_v53, %v540_v49 }
 0x1bc   : > { %v585_v1 = vrot.slane %v584_v54, 2  ;;  %v614_v2 = vmul.f32 0.5, %v613_v57  ;;  %v695_v57 = vld [vmem:[%s1540_s3 + $0x20] sm:$0xff] }
 0x1bd   : > { %v596_v3 = vmul.f32 0.00048828125, %v558_v58  ;;  %v597_v6 = vmul.f32 0.00048828125, %v564_v62  ;;  %v579_v7 = vrot.slane %v578_v0, 2 }
 0x1be   : > { %v586_v4 = vadd.f32 %v585_v1, %v584_v54  ;;  %v615_v5 = vsub.f32 1.5, %v614_v2 }
 0x1bf   : > { %v1051_v8 = vpop.eup %1050  ;;  %v1404_v9 = vadd.f32 1e-05, %v596_v3  ;;  %v1406_v33 = vadd.f32 1e-05, %v597_v6  ;;  %v580_v10 = vadd.f32 %v579_v7, %v578_v0  ;;  %v534_v11 = vpop.xlane.xlu0 %533 }
 0x1c0   : > { %v546_v13 = vpop.xlane.xlu1 %545  ;;  %v652_v14 = vmul.f32 %v1051_v8, %v1401_v42  ;;  %v587_v15 = vrot.slane %v586_v4, 1  ;;  %v565_v16 = vrot.slane %v534_v11, 4  ;;  %v616_v21 = vmul.f32 %v1049_v41, %v615_v5 }
 0x1c1   : > { %v589_v17 = vrot.slane %v546_v13, 4  ;;  %1052 = vrsqrt.f32 %v1404_v9  ;;  %v581_v20 = vrot.slane %v580_v10, 1  ;;  %vm658_vm4 = vweird.f32 %v1051_v8 }
 0x1c2   : > { %v588_v22 = vadd.f32 %v587_v15, %v586_v4  ;;  %v566_v23 = vadd.f32 %v565_v16, %v534_v11  ;;  %1054 = vrsqrt.f32 %v1406_v33  ;;  %v620_v50 = vsel %vm619_vm3, %v1049_v41, %v616_v21  ;;  %vm659_vm6 = vmor %vm657_vm5, %vm658_vm4  ;;  %v692_v16 = vld [vmem:[%s1540_s3 + $0x8] sm:$0xff] }
 0x1c3   : > { %v590_v24 = vadd.f32 %v589_v17, %v546_v13  ;;  %v582_v25 = vadd.f32 %v581_v20, %v580_v10  ;;  %v653_v26 = vmul.f32 %v1051_v8, %v652_v14  ;;  %v699_v34 = vmul.f32 %v691_v40, %v620_v50 }
 0x1c4   : > { %v601_v52 = vmul.f32 0.00048828125, %v588_v22  ;;  %v567_v31 = vrot.slane %v566_v23, 2  ;;  %vm627_vm8 = vweird.f32 %v1404_v9  ;;  %vm637_vm3 = vweird.f32 %v1406_v33 }
 0x1c5   : > { %v591_v32 = vrot.slane %v590_v24, 2  ;;  %v600_v39 = vmul.f32 0.00048828125, %v582_v25  ;;  %v654_v43 = vmul.f32 0.5, %v653_v26  ;;  %709 = vperm.xlu2 %1047, %v699_v34   ;;  %v697_v34 = vld [vmem:[%s1540_s3 + $0x30] sm:$0xff] }
 0x1c6   : > { %v609_v38 = vadd.f32 1e-05, %v601_v52  ;;  %v568_v27 = vadd.f32 %v567_v31, %v566_v23 }
 0x1c7   : > { %v592_v47 = vadd.f32 %v591_v32, %v590_v24  ;;  %v1053_v48 = vpop.eup %1052  ;;  %v1414_v46 = vadd.f32 1e-05, %v600_v39  ;;  %v655_v49 = vsub.f32 1.5, %v654_v43 }
 0x1c8   : > { %v622_v29 = vmul.f32 %v1053_v48, %v1404_v9  ;;  %1056 = vrsqrt.f32 %v609_v38  ;;  %v569_v41 = vrot.slane %v568_v27, 1  ;;  %v1417_v53 = vpop.eup %1054  ;;  %vm628_vm7 = vweird.f32 %v1053_v48 }
 0x1c9   : > { %v593_v51 = vrot.slane %v592_v47, 1  ;;  %1058 = vrsqrt.f32 %v1414_v46  ;;  %v656_v54 = vmul.f32 %v1051_v8, %v655_v49  ;;  %v632_v4 = vmul.f32 %v1417_v53, %v1406_v33  ;;  %vm629_vm9 = vmor %vm627_vm8, %vm628_vm7  ;;  %v693_v33 = vld [vmem:[%s1540_s3 + $0x10] sm:$0xff] }
 0x1ca   : > { %v570_v58 = vadd.f32 %v569_v41, %v568_v27  ;;  %v623_v0 = vmul.f32 %v1053_v48, %v622_v29  ;;  %vm677_vm12 = vweird.f32 %v609_v38  ;;  %vm667_vm14 = vweird.f32 %v1414_v46  ;;  %v696_v27 = vld [vmem:[%s1540_s3 + $0x28] sm:$0xff] }
 0x1cb   : > { %v594_v62 = vadd.f32 %v593_v51, %v592_v47  ;;  %v660_v1 = vsel %vm659_vm6, %v1051_v8, %v656_v54  ;;  %v633_v20 = vmul.f32 %v1417_v53, %v632_v4  ;;  %vm638_vm0 = vweird.f32 %v1417_v53 }
 0x1cc   : > { %v598_v2 = vmul.f32 0.00048828125, %v570_v58  ;;  %v703_v6 = vmul.f32 %v695_v57, %v660_v1  ;;  %v624_v7 = vmul.f32 0.5, %v623_v0  ;;  %v694_v1 = vld [vmem:[%s1540_s3 + $0x18] sm:$0xff]  ;;  %vm639_vm5 = vmor %vm637_vm3, %vm638_vm0 }
 0x1cd   : > { %v602_v3 = vmul.f32 0.00048828125, %v594_v62  ;;  %v634_v50 = vmul.f32 0.5, %v633_v20 }
 0x1ce   : > { %v1057_v5 = vpop.eup %1056  ;;  %v606_v10 = vadd.f32 1e-05, %v598_v2  ;;  %729 = vperm.xlu2 %1047, %v703_v6   ;;  %v625_v42 = vsub.f32 1.5, %v624_v7 }
 0x1cf   : > { %v1426_v11 = vadd.f32 1e-05, %v602_v3  ;;  %v1059_v13 = vpop.eup %1058  ;;  %v672_v14 = vmul.f32 %v1057_v5, %v609_v38  ;;  %vm678_vm10 = vweird.f32 %v1057_v5  ;;  %v635_v49 = vsub.f32 1.5, %v634_v50  ;;  %v698_v3 = vld [vmem:[%s1540_s3 + $0x38] sm:$0xff] }
 0x1d0   : > { %v662_v15 = vmul.f32 %v1059_v13, %v1414_v46  ;;  %1060 = vrsqrt.f32 %v606_v10  ;;  %v626_v8 = vmul.f32 %v1053_v48, %v625_v42  ;;  %vm668_vm11 = vweird.f32 %v1059_v13  ;;  %vm679_vm13 = vmor %vm677_vm12, %vm678_vm10 }
 0x1d1   : > { %1062 = vrsqrt.f32 %v1426_v11  ;;  %v673_v17 = vmul.f32 %v1057_v5, %v672_v14  ;;  %vm669_vm15 = vmor %vm667_vm14, %vm668_vm11  ;;  %v636_v46 = vmul.f32 %v1417_v53, %v635_v49  ;;  %vm647_vm4 = vweird.f32 %v606_v10  ;;  %v784_v14 = vpop.permute.xlu2 %783 }
 0x1d2   : > { %v630_v21 = vsel %vm629_vm9, %v1053_v48, %v626_v8  ;;  %v663_v40 = vmul.f32 %v1059_v13, %v662_v15  ;;  %vm687_vm7 = vweird.f32 %v1426_v11  ;;  %v779_v15 = vpop.permute.xlu0 %778 }
 0x1d3   : > { %v700_v22 = vmul.f32 %v692_v16, %v630_v21  ;;  %v674_v23 = vmul.f32 0.5, %v673_v17  ;;  %v640_v7 = vsel %vm639_vm5, %v1417_v53, %v636_v46  ;;  %v768_v53 = vld [vmem:[%s1541_s4 + $0x28] sm:$0xff] }
 0x1d4   : > { %v664_v24 = vmul.f32 0.5, %v663_v40  ;;  %v701_v42 = vmul.f32 %v693_v33, %v640_v7 }
 0x1d5   : > { %714 = vperm.xlu0 %1045, %v700_v22   ;;  %v675_v25 = vsub.f32 1.5, %v674_v23 }
 0x1d6   : > { %v1061_v9 = vpop.eup %1060  ;;  %v665_v26 = vsub.f32 1.5, %v664_v24 }
 0x1d7   : > { %v1063_v52 = vpop.eup %1062  ;;  %v642_v31 = vmul.f32 %v1061_v9, %v606_v10  ;;  %v676_v32 = vmul.f32 %v1057_v5, %v675_v25  ;;  %vm648_vm1 = vweird.f32 %v1061_v9  ;;  %v774_v20 = vpop.permute.xlu1 %773 }
 0x1d8   : > { %v682_v39 = vmul.f32 %v1063_v52, %v1426_v11  ;;  %v666_v43 = vmul.f32 %v1059_v13, %v665_v26  ;;  %vm688_vm2 = vweird.f32 %v1063_v52  ;;  %vm649_vm6 = vmor %vm647_vm4, %vm648_vm1  ;;  %v770_v11 = vld [vmem:[%s1541_s4 + $0x38] sm:$0xff] }
 0x1d9   : > { %v680_v47 = vsel %vm679_vm13, %v1057_v5, %v676_v32  ;;  %v643_v48 = vmul.f32 %v1061_v9, %v642_v31  ;;  %vm689_vm8 = vmor %vm687_vm7, %vm688_vm2 }
 0x1da   : > { %v705_v29 = vmul.f32 %v697_v34, %v680_v47  ;;  %v670_v38 = vsel %vm669_vm15, %v1059_v13, %v666_v43  ;;  %v683_v41 = vmul.f32 %v1063_v52, %v682_v39  ;;  %v769_v13 = vld [vmem:[%s1541_s4 + $0x30] sm:$0xff]  ;;  %v794_v50 = vpop.permute.xlu0 %793 }
 0x1db   : > { %v704_v51 = vmul.f32 %v696_v27, %v670_v38  ;;  %v644_v54 = vmul.f32 0.5, %v643_v48 }
 0x1dc   : > { %v684_v57 = vmul.f32 0.5, %v683_v41 }
 0x1dd   : > { %739 = vperm.xlu0 %1045, %v705_v29   ;;  %734 = vperm.xlu1 %1046, %v704_v51   ;;  %v645_v58 = vsub.f32 1.5, %v644_v54 }
 0x1de   : > { %v685_v62 = vsub.f32 1.5, %v684_v57 }
 0x1df   : > { %v646_v0 = vmul.f32 %v1061_v9, %v645_v58  ;;  %v789_v31 = vpop.permute.xlu1 %788 }
 0x1e0   : > { %v686_v2 = vmul.f32 %v1063_v52, %v685_v62 }
 0x1e1   : > { %v650_v6 = vsel %vm649_vm6, %v1061_v9, %v646_v0 }
 0x1e2   : > { %v702_v4 = vmul.f32 %v694_v1, %v650_v6  ;;  %v690_v5 = vsel %vm689_vm8, %v1063_v52, %v686_v2 }
 0x1e3   : > { %v706_v10 = vmul.f32 %v698_v3, %v690_v5 }
 0x1e5   : > { %724 = vperm.xlu0 %1045, %v702_v4   ;;  %744 = vperm.xlu2 %1047, %v706_v10  }
 0x1e6   : > { %719 = vperm.xlu1 %1046, %v701_v42  }
 0x1ed   : > { %808 = vperm.xlu0 %1045, %v770_v11   ;;  %798 = vperm.xlu2 %1047, %v768_v53  }
 0x1ee   : > { %803 = vperm.xlu1 %1046, %v769_v13  }
 0x21f   : > { %v710_v8 = vpop.permute.xlu2 %709 }
 0x220   : > { %v747_v16 = vmul.f32 %v710_v8, %v1307_v28  ;;  %v748_v17 = vmul.f32 %v710_v8, %v1310_v30 }
 0x222   : > { %v811_v21 = vadd.f32 %v774_v20, %v747_v16  ;;  %v812_v40 = vadd.f32 %v774_v20, %v748_v17 }
 0x224   : > { %v827_v22 = vmax.f32 %v811_v21, 0.0  ;;  %v828_v23 = vmax.f32 %v812_v40, 0.0 }
 0x226   : > { %843 = vst [vmem:[%s1471_s26] sm:$0xff] %v827_v22 }
 0x227   : > { %844 = vst [vmem:[%s1471_s26 + $0x8] sm:$0xff] %v828_v23 }
 0x228   : > { %v730_v24 = vpop.permute.xlu2 %729 }
 0x229   : > { %v755_v25 = vmul.f32 %v730_v24, %v1317_v55  ;;  %v756_v28 = vmul.f32 %v730_v24, %v1320_v56 }
 0x22b   : > { %v819_v30 = vadd.f32 %v794_v50, %v755_v25  ;;  %v820_v9 = vadd.f32 %v794_v50, %v756_v28 }
 0x22d   : > { %v835_v26 = vmax.f32 %v819_v30, 0.0  ;;  %v836_v52 = vmax.f32 %v820_v9, 0.0 }
 0x22f   : > { %851 = vst [vmem:[%s1471_s26 + $0x40] sm:$0xff] %v835_v26 }
 0x230   : > { %852 = vst [vmem:[%s1471_s26 + $0x48] sm:$0xff] %v836_v52 }
 0x23f   : > { %v745_v32 = vpop.permute.xlu2 %744 }
 0x240   : > { %v762_v4 = vmul.f32 %v745_v32, %v1380_v63 }
 0x247   : > { %v715_v34 = vpop.permute.xlu0 %714  ;;  %v799_v41 = vpop.permute.xlu2 %798 }
 0x248   : > { %v749_v39 = vmul.f32 %v715_v34, %v1327_v36  ;;  %v750_v43 = vmul.f32 %v715_v34, %v1330_v12 }
 0x24a   : > { %v813_v55 = vadd.f32 %v779_v15, %v749_v39  ;;  %v814_v56 = vadd.f32 %v779_v15, %v750_v43 }
 0x24c   : > { %v829_v27 = vmax.f32 %v813_v55, 0.0  ;;  %v830_v47 = vmax.f32 %v814_v56, 0.0 }
 0x24e   : > { %845 = vst [vmem:[%s1471_s26 + $0x10] sm:$0xff] %v829_v27 }
 0x24f   : > { %846 = vst [vmem:[%s1471_s26 + $0x18] sm:$0xff] %v830_v47  ;;  %v740_v48 = vpop.permute.xlu0 %739  ;;  %v735_v49 = vpop.permute.xlu1 %734 }
 0x250   : > { %v757_v29 = vmul.f32 %v735_v49, %v1347_v35  ;;  %v758_v38 = vmul.f32 %v735_v49, %v1350_v37 }
 0x252   : > { %v821_v51 = vadd.f32 %v799_v41, %v757_v29  ;;  %v822_v36 = vadd.f32 %v799_v41, %v758_v38 }
 0x254   : > { %v837_v54 = vmax.f32 %v821_v51, 0.0  ;;  %v838_v12 = vmax.f32 %v822_v36, 0.0 }
 0x256   : > { %853 = vst [vmem:[%s1471_s26 + $0x50] sm:$0xff] %v837_v54 }
 0x257   : > { %854 = vst [vmem:[%s1471_s26 + $0x58] sm:$0xff] %v838_v12  ;;  %v725_v57 = vpop.permute.xlu0 %724 }
 0x258   : > { %v753_v58 = vmul.f32 %v725_v57, %v1367_v59  ;;  %v754_v46 = vmul.f32 %v725_v57, %v1370_v60  ;;  %v720_v62 = vpop.permute.xlu1 %719  ;;  %v761_v60 = vmul.f32 %v745_v32, %v1377_v61 }
 0x259   : > { %v751_v0 = vmul.f32 %v720_v62, %v1333_v18  ;;  %v752_v35 = vmul.f32 %v720_v62, %v1336_v19  ;;  %v759_v18 = vmul.f32 %v740_v48, %v1353_v44  ;;  %v760_v19 = vmul.f32 %v740_v48, %v1356_v45 }
 0x25a   : > { %v817_v37 = vadd.f32 %v789_v31, %v753_v58  ;;  %v818_v1 = vadd.f32 %v789_v31, %v754_v46 }
 0x25b   : > { %v815_v2 = vadd.f32 %v784_v14, %v751_v0  ;;  %v816_v3 = vadd.f32 %v784_v14, %v752_v35 }
 0x25c   : > { %v833_v6 = vmax.f32 %v817_v37, 0.0  ;;  %v834_v7 = vmax.f32 %v818_v1, 0.0 }
 0x25d   : > { %v831_v33 = vmax.f32 %v815_v2, 0.0  ;;  %v832_v59 = vmax.f32 %v816_v3, 0.0 }
 0x25e   : > { %849 = vst [vmem:[%s1471_s26 + $0x30] sm:$0xff] %v833_v6 }
 0x25f   : > { %850 = vst [vmem:[%s1471_s26 + $0x38] sm:$0xff] %v834_v7  ;;  %v809_v5 = vpop.permute.xlu0 %808 }
 0x260   : > { %847 = vst [vmem:[%s1471_s26 + $0x20] sm:$0xff] %v831_v33  ;;  %v825_v10 = vadd.f32 %v809_v5, %v761_v60  ;;  %v826_v42 = vadd.f32 %v809_v5, %v762_v4  ;;  %v804_v61 = vpop.permute.xlu1 %803 }
 0x261   : > { %848 = vst [vmem:[%s1471_s26 + $0x28] sm:$0xff] %v832_v59  ;;  %v823_v63 = vadd.f32 %v804_v61, %v759_v18  ;;  %v824_v11 = vadd.f32 %v804_v61, %v760_v19 }
 0x262   : > { %v841_v44 = vmax.f32 %v825_v10, 0.0  ;;  %v842_v53 = vmax.f32 %v826_v42, 0.0 }
 0x263   : > { %v839_v45 = vmax.f32 %v823_v63, 0.0  ;;  %v840_v13 = vmax.f32 %v824_v11, 0.0 }
 0x264   : > { %857 = vst [vmem:[%s1471_s26 + $0x70] sm:$0xff] %v841_v44 }
 0x265   : > { %858 = vst [vmem:[%s1471_s26 + $0x78] sm:$0xff] %v842_v53 }
 0x266   : > { %855 = vst [vmem:[%s1471_s26 + $0x60] sm:$0xff] %v839_v45 }
 0x267   : > { %856 = vst [vmem:[%s1471_s26 + $0x68] sm:$0xff] %v840_v13 }
 0x268   : > { %1091 = shalt.err (!%p1088_p3)
}
 0x269   : > { %s1129_s23 = smov 256   ;;  %s1130_s25 = smov 16  }
 0x26a   : > { %1003 = dma.vmem_to_hbm [thread:$0]  (%p1199_p5), %s873_s22, 2048, %s875_s9, %s860_s10, %s1129_s23, %s1129_s23, %s1130_s25  }
 0x26b PF: > { %p1009_p4 = scmp.ge.s32.totalorder %s1126_s21, 2  ;;  %s889_s26 = sand.u32 1, %s1114_s18  }
 0x26c   : > { %s890_s30 = scalar_lea.sflag [#allocation3], %s889_s26 }
 0x26d   : > { %p1006_p7 = pnand %p1009_p4, %p1203_p6 }
 0x26f   : > { %p1007_p8 = pneg %p1006_p7 }
 0x271   : > { %1109 = dma.done.wait (%p1007_p8), %s890_s30, 2048  }
 0x272   : > { %1111 = vsyncadd (%p1007_p8), %s890_s30, 4294965248  ;;  %p15_p9 = scmp.ge.s32.totalorder %s1186_s24, 4   ;;  %s1545_s18 = smov %s1118_s19 }
 0x273   : > { %s1546_s19 = smov %s1122_s20  ;;  %s1547_s20 = smov %s1197_s27 }
 0x274   : > { %s1548_s21 = smov %s1186_s24  ;;  %17 = sbr.rel (!%p15_p9) target bundleno = 3 (0x3), region = 75 }
 0x279   :  { %896 = vsyncpa [#allocation3], 1 }
 0x27a   :  { %898 = vsyncpa [#allocation3 + $0x1], 1 }

</bundles_post_ra>
